<compile_context>
chip_gen: v7x
topology: tpu7x:2x2x1
jax: 0.10.0
libtpu: 0.0.40
codegen_flags: <defaults>
</compile_context>

<pallas_src>
import functools
import math

import numpy as np
import jax
import jax.numpy as jnp
from jax.experimental import pallas as pl
from jax.experimental.pallas import tpu as pltpu


def _round_up(x: int, m: int) -> int:
    return (x + m - 1) // m * m


def _time_embed_kernel(t_ref, freqs_ref, phase_ref, w1_ref, b1_ref, w2_ref,
                       b2_ref, o_ref, *, matmul_dtype):
    """Computes one (TB, n_pad) output tile.

    t_ref:     (TB, 1)        f32            batch tile of timesteps
    freqs_ref: (1, F)         f32            duplicated frequencies [f, f]
    phase_ref: (1, F)         f32            [0,...,0, pi/2,...,pi/2]
    w1_ref:    (F, n_pad)     matmul_dtype   zero-padded columns
    b1_ref:    (1, n_pad)     f32            zero-padded
    w2_ref:    (n_pad, n_pad) matmul_dtype   zero-padded rows/cols
    b2_ref:    (1, n_pad)     f32            zero-padded
    o_ref:     (TB, n_pad)    out dtype
    """
    # One EUP transcendental per lane: cos(x) == sin(x + pi/2), so the
    # torch.cat((sin, cos), dim=-1) layout falls out of a single sin against
    # duplicated freqs + a phase row.  No iota, no select, no XLU relayout.
    arg = t_ref[...] * freqs_ref[...] + phase_ref[...]            # (TB, F)
    feat = jnp.sin(arg)

    # fc[0]: Linear(F -> embed_dim); MXU in matmul_dtype, f32 accumulate.
    h = jnp.dot(feat.astype(matmul_dtype), w1_ref[...],
                preferred_element_type=jnp.float32) + b1_ref[...]
    # fc[1]: SiLU in f32 (sigmoid rides the EUP slot).
    h = h * jax.nn.sigmoid(h)
    # fc[2]: Linear(embed_dim -> embed_dim); padded lanes stay exactly 0
    # (zero w1 cols -> h=0 -> SiLU(0)=0 -> zero w2 rows, zero b2 pad).
    out = jnp.dot(h.astype(matmul_dtype), w2_ref[...],
                  preferred_element_type=jnp.float32) + b2_ref[...]
    o_ref[...] = out.astype(o_ref.dtype)


def prepare_time_embed_params(w1, b1, w2, b2, freq_embed_dim=128,
                              matmul_dtype=jnp.bfloat16):
    """Pad / cast parameters ONCE (hoisted out of the per-call path).

    w1: (freq_embed_dim, embed_dim), b1: (embed_dim,),
    w2: (embed_dim, embed_dim),      b2: (embed_dim,)
    (PyTorch Linear weights already transposed to x @ W layout.)
    """
    assert freq_embed_dim % 2 == 0 and freq_embed_dim >= 4, \
        "freq_embed_dim must be even and >= 4 (half-1 divides)"
    half = freq_embed_dim // 2
    embed_dim = int(w1.shape[1])
    n_pad = _round_up(embed_dim, 128)       # lane-dense N for matmuls + store

    # Same convention as the torch module: log(10000) / (half - 1).
    log_scale = math.log(10000.0) / (half - 1)
    freqs = jnp.exp(jnp.arange(half, dtype=jnp.float32) * -log_scale)
    freqs_dup = jnp.concatenate([freqs, freqs]).reshape(1, freq_embed_dim)
    phase = jnp.concatenate(
        [jnp.zeros((half,), jnp.float32),
         jnp.full((half,), np.pi / 2, dtype=jnp.float32)]
    ).reshape(1, freq_embed_dim)

    w1p = jnp.zeros((freq_embed_dim, n_pad), matmul_dtype)
    w1p = w1p.at[:, :embed_dim].set(w1.astype(matmul_dtype))
    b1p = jnp.zeros((1, n_pad), jnp.float32)
    b1p = b1p.at[:, :embed_dim].set(b1.astype(jnp.float32).reshape(1, embed_dim))
    w2p = jnp.zeros((n_pad, n_pad), matmul_dtype)
    w2p = w2p.at[:embed_dim, :embed_dim].set(w2.astype(matmul_dtype))
    b2p = jnp.zeros((1, n_pad), jnp.float32)
    b2p = b2p.at[:, :embed_dim].set(b2.astype(jnp.float32).reshape(1, embed_dim))

    return dict(freqs=freqs_dup, phase=phase, w1=w1p, b1=b1p, w2=w2p, b2=b2p,
                embed_dim=embed_dim, n_pad=n_pad,
                freq_embed_dim=freq_embed_dim, matmul_dtype=matmul_dtype)


def time_position_embedding(t, params, *, out_dtype=jnp.float32, tb=None):
    """t: (B,) -> (B, embed_dim).  `params` from prepare_time_embed_params.

    Pass out_dtype=jnp.bfloat16 if the consumer accepts bf16 (halves output
    writeback bytes).
    """
    B = int(t.shape[0])
    embed_dim = params["embed_dim"]
    n_pad = params["n_pad"]
    F = params["freq_embed_dim"]
    matmul_dtype = params["matmul_dtype"]

    # Batch tile: multiple of 8 sublanes; scale with n_pad (bigger tiles for
    # small embed_dim amortize the ~0.35us/step overhead, smaller tiles keep
    # big embed_dim inside v7x's VMEM budget).
    if tb is None:
        if n_pad <= 256:
            tb_cap = 1024
        elif n_pad <= 512:
            tb_cap = 512
        else:
            tb_cap = 256
        tb = min(tb_cap, _round_up(max(B, 1), 8))
    TB = _round_up(int(tb), 8)
    grid = (pl.cdiv(B, TB),)      # partial last block handled by Pallas

    t2 = t.astype(jnp.float32).reshape(B, 1)

    # Explicit scoped-VMEM budget: pinned operands single-buffered (Buffered(1)),
    # t/out double-buffered; 2x slack + headroom, capped at v7x's 64 MiB.
    w_bytes = jnp.dtype(matmul_dtype).itemsize
    out_bytes = jnp.dtype(out_dtype).itemsize
    vmem_bytes = (2 * TB * 4                                  # t tile (x2 bufs)
                  + 2 * F * 4                                 # freqs + phase
                  + F * n_pad * w_bytes + n_pad * 4           # w1, b1
                  + n_pad * n_pad * w_bytes + n_pad * 4       # w2, b2
                  + 2 * TB * n_pad * out_bytes)               # out tile (x2 bufs)
    vmem_limit = int(min(64 * 1024 * 1024,
                         max(2 * vmem_bytes + (2 << 20), 8 << 20)))

    kernel = functools.partial(_time_embed_kernel, matmul_dtype=matmul_dtype)
    # Constant index_map -> no benefit from double-buffering these.
    pinned = dict(pipeline_mode=pl.Buffered(1))

    out = pl.pallas_call(
        kernel,
        out_shape=jax.ShapeDtypeStruct((B, n_pad), out_dtype),
        grid_spec=pltpu.PrefetchScalarGridSpec(
            num_scalar_prefetch=0,
            grid=grid,
            in_specs=[
                pl.BlockSpec((TB, 1), lambda i: (i, 0)),                   # t
                pl.BlockSpec((1, F), lambda i: (0, 0), **pinned),          # freqs
                pl.BlockSpec((1, F), lambda i: (0, 0), **pinned),          # phase
                pl.BlockSpec((F, n_pad), lambda i: (0, 0), **pinned),      # w1
                pl.BlockSpec((1, n_pad), lambda i: (0, 0), **pinned),      # b1
                pl.BlockSpec((n_pad, n_pad), lambda i: (0, 0), **pinned),  # w2
                pl.BlockSpec((1, n_pad), lambda i: (0, 0), **pinned),      # b2
            ],
            out_specs=pl.BlockSpec((TB, n_pad), lambda i: (i, 0)),
        ),
        compiler_params=pltpu.CompilerParams(
            # NOTE(v7x): megacore only pays off with several grid steps per
            # core; in the weight-bound regime both cores re-DMA the weights.
            dimension_semantics=("parallel",),
            vmem_limit_bytes=vmem_limit),
    )(t2, params["freqs"], params["phase"], params["w1"], params["b1"],
      params["w2"], params["b2"])

    # Lane-dense (unmasked) stores inside the kernel; slice (an extra HBM->HBM
    # copy) only when embed_dim is not already 128-aligned.
    if embed_dim != n_pad:
        out = out[:, :embed_dim]
    return out


def reference(t, w1, b1, w2, b2, freq_embed_dim=128):
    """Plain-JAX reference matching the PyTorch forward exactly."""
    half = freq_embed_dim // 2
    log_scale = np.log(10000.0) / (half - 1)
    freqs = jnp.exp(jnp.arange(half, dtype=jnp.float32) * -log_scale)
    arg = t[:, None] * freqs[None, :]
    feat = jnp.concatenate([jnp.sin(arg), jnp.cos(arg)], axis=-1)
    h = feat @ w1 + b1
    h = h * jax.nn.sigmoid(h)
    return h @ w2 + b2


if __name__ == "__main__":
    B = 8
    freq_embed_dim = 128
    embed_dim = 32

    key = jax.random.PRNGKey(0)
    k_t, k_w1, k_b1, k_w2, k_b2 = jax.random.split(key, 5)

    # Deterministic synthetic parameters of the right shapes.
    t = jax.random.uniform(k_t, (B,), dtype=jnp.float32) * 1000.0
    w1 = jax.random.normal(k_w1, (freq_embed_dim, embed_dim), dtype=jnp.float32) * 0.05
    b1 = jax.random.normal(k_b1, (embed_dim,), dtype=jnp.float32) * 0.05
    w2 = jax.random.normal(k_w2, (embed_dim, embed_dim), dtype=jnp.float32) * 0.05
    b2 = jax.random.normal(k_b2, (embed_dim,), dtype=jnp.float32) * 0.05

    ref = jax.block_until_ready(reference(t, w1, b1, w2, b2, freq_embed_dim))

    # f32-MXU path: tight check of the fused structure (sin+phase trick etc.).
    params_f32 = prepare_time_embed_params(w1, b1, w2, b2, freq_embed_dim,
                                           matmul_dtype=jnp.float32)
    out_f32 = jax.block_until_ready(time_position_embedding(t, params_f32))
    np.testing.assert_allclose(np.asarray(out_f32), np.asarray(ref),
                               rtol=1e-4, atol=1e-4)

    # bf16-MXU path (default, recommended on v6e/v7x): relaxed tolerance.
    params_bf16 = prepare_time_embed_params(w1, b1, w2, b2, freq_embed_dim,
                                            matmul_dtype=jnp.bfloat16)
    out_bf16 = jax.block_until_ready(time_position_embedding(t, params_bf16))
    np.testing.assert_allclose(np.asarray(out_bf16), np.asarray(ref),
                               rtol=3e-2, atol=3e-2)

    print("KERNEL_OK")
</pallas_src>

<mosaic_0001>
module attributes {stable_mosaic.version = 11 : i64} {
  func.func @_time_embed_kernel(%arg0: i32, %arg1: memref<8x1xf32, #tpu.memory_space<vmem>>, %arg2: memref<1x128xf32, #tpu.memory_space<vmem>>, %arg3: memref<1x128xf32, #tpu.memory_space<vmem>>, %arg4: memref<128x128xf32, #tpu.memory_space<vmem>>, %arg5: memref<1x128xf32, #tpu.memory_space<vmem>>, %arg6: memref<128x128xf32, #tpu.memory_space<vmem>>, %arg7: memref<1x128xf32, #tpu.memory_space<vmem>>, %arg8: memref<8x128xf32, #tpu.memory_space<vmem>>) attributes {dimension_semantics = [#tpu.dimension_semantics<parallel>], iteration_bounds = array<i64: 1>, scalar_prefetch = 0 : i64, scratch_operands = 0 : i64, tpu.core_type = #tpu.core_type<tc>, window_params = [{transform_indices = @transform_0, window_bounds = array<i64: 8, 1>}, {pipeline_mode = #tpu.pipeline_mode<synchronous>, transform_indices = @transform_1, window_bounds = array<i64: 1, 128>}, {pipeline_mode = #tpu.pipeline_mode<synchronous>, transform_indices = @transform_2, window_bounds = array<i64: 1, 128>}, {pipeline_mode = #tpu.pipeline_mode<synchronous>, transform_indices = @transform_3, window_bounds = array<i64: 128, 128>}, {pipeline_mode = #tpu.pipeline_mode<synchronous>, transform_indices = @transform_4, window_bounds = array<i64: 1, 128>}, {pipeline_mode = #tpu.pipeline_mode<synchronous>, transform_indices = @transform_5, window_bounds = array<i64: 128, 128>}, {pipeline_mode = #tpu.pipeline_mode<synchronous>, transform_indices = @transform_6, window_bounds = array<i64: 1, 128>}, {transform_indices = @transform_7, window_bounds = array<i64: 8, 128>}]} {
    %c0 = arith.constant 0 : index
    %c0_0 = arith.constant 0 : index
    %0 = vector.load %arg1[%c0, %c0_0] : memref<8x1xf32, #tpu.memory_space<vmem>>, vector<8x1xf32>
    %c0_1 = arith.constant 0 : index
    %c0_2 = arith.constant 0 : index
    %1 = vector.load %arg2[%c0_1, %c0_2] : memref<1x128xf32, #tpu.memory_space<vmem>>, vector<1x128xf32>
    %2 = vector.broadcast %0 : vector<8x1xf32> to vector<8x128xf32>
    %3 = vector.broadcast %1 : vector<1x128xf32> to vector<8x128xf32>
    %4 = arith.mulf %2, %3 : vector<8x128xf32>
    %c0_3 = arith.constant 0 : index
    %c0_4 = arith.constant 0 : index
    %5 = vector.load %arg3[%c0_3, %c0_4] : memref<1x128xf32, #tpu.memory_space<vmem>>, vector<1x128xf32>
    %6 = vector.broadcast %5 : vector<1x128xf32> to vector<8x128xf32>
    %7 = arith.addf %4, %6 : vector<8x128xf32>
    %8 = math.sin %7 : vector<8x128xf32>
    %c0_5 = arith.constant 0 : index
    %c0_6 = arith.constant 0 : index
    %9 = vector.load %arg4[%c0_5, %c0_6] : memref<128x128xf32, #tpu.memory_space<vmem>>, vector<128x128xf32>
    %cst = arith.constant dense<0.000000e+00> : vector<8x128xf32>
    %10 = tpu.matmul %8, %9, %cst {dimension_numbers = #tpu.dot_dimension_numbers<[1], [0], [0], [1], [0, 0, 1, 1], [], []>} : vector<8x128xf32>, vector<128x128xf32>, vector<8x128xf32> -> vector<8x128xf32>
    %c0_7 = arith.constant 0 : index
    %c0_8 = arith.constant 0 : index
    %11 = vector.load %arg5[%c0_7, %c0_8] : memref<1x128xf32, #tpu.memory_space<vmem>>, vector<1x128xf32>
    %12 = vector.broadcast %11 : vector<1x128xf32> to vector<8x128xf32>
    %13 = arith.addf %10, %12 : vector<8x128xf32>
    %14 = arith.negf %13 : vector<8x128xf32>
    %15 = math.exp %14 : vector<8x128xf32>
    %cst_9 = arith.constant 1.000000e+00 : f32
    %16 = vector.broadcast %cst_9 : f32 to vector<8x128xf32>
    %17 = arith.addf %16, %15 : vector<8x128xf32>
    %18 = arith.divf %16, %17 : vector<8x128xf32>
    %19 = arith.mulf %13, %18 : vector<8x128xf32>
    %c0_10 = arith.constant 0 : index
    %c0_11 = arith.constant 0 : index
    %20 = vector.load %arg6[%c0_10, %c0_11] : memref<128x128xf32, #tpu.memory_space<vmem>>, vector<128x128xf32>
    %cst_12 = arith.constant dense<0.000000e+00> : vector<8x128xf32>
    %21 = tpu.matmul %19, %20, %cst_12 {dimension_numbers = #tpu.dot_dimension_numbers<[1], [0], [0], [1], [0, 0, 1, 1], [], []>} : vector<8x128xf32>, vector<128x128xf32>, vector<8x128xf32> -> vector<8x128xf32>
    %c0_13 = arith.constant 0 : index
    %c0_14 = arith.constant 0 : index
    %22 = vector.load %arg7[%c0_13, %c0_14] : memref<1x128xf32, #tpu.memory_space<vmem>>, vector<1x128xf32>
    %23 = vector.broadcast %22 : vector<1x128xf32> to vector<8x128xf32>
    %24 = arith.addf %21, %23 : vector<8x128xf32>
    %c0_15 = arith.constant 0 : index
    %c0_16 = arith.constant 0 : index
    %25 = vector.load %arg8[%c0_15, %c0_16] : memref<8x128xf32, #tpu.memory_space<vmem>>, vector<8x128xf32>
    tpu.vector_store %arg8[%c0_15, %c0_16], %24 {strides = array<i32>} : memref<8x128xf32, #tpu.memory_space<vmem>>, vector<8x128xf32>,
    return
  }
  func.func @transform_0(%arg0: i32) -> (i32, i32) {
    %c0_i32 = arith.constant 0 : i32
    %c0_i32_0 = arith.constant 0 : i32
    return %arg0, %c0_i32 : i32, i32
  }
  func.func @transform_1(%arg0: i32) -> (i32, i32) {
    %c0_i32 = arith.constant 0 : i32
    %c0_i32_0 = arith.constant 0 : i32
    %c0_i32_1 = arith.constant 0 : i32
    return %c0_i32, %c0_i32_0 : i32, i32
  }
  func.func @transform_2(%arg0: i32) -> (i32, i32) {
    %c0_i32 = arith.constant 0 : i32
    %c0_i32_0 = arith.constant 0 : i32
    %c0_i32_1 = arith.constant 0 : i32
    return %c0_i32, %c0_i32_0 : i32, i32
  }
  func.func @transform_3(%arg0: i32) -> (i32, i32) {
    %c0_i32 = arith.constant 0 : i32
    %c0_i32_0 = arith.constant 0 : i32
    %c0_i32_1 = arith.constant 0 : i32
    return %c0_i32, %c0_i32_0 : i32, i32
  }
  func.func @transform_4(%arg0: i32) -> (i32, i32) {
    %c0_i32 = arith.constant 0 : i32
    %c0_i32_0 = arith.constant 0 : i32
    %c0_i32_1 = arith.constant 0 : i32
    return %c0_i32, %c0_i32_0 : i32, i32
  }
  func.func @transform_5(%arg0: i32) -> (i32, i32) {
    %c0_i32 = arith.constant 0 : i32
    %c0_i32_0 = arith.constant 0 : i32
    %c0_i32_1 = arith.constant 0 : i32
    return %c0_i32, %c0_i32_0 : i32, i32
  }
  func.func @transform_6(%arg0: i32) -> (i32, i32) {
    %c0_i32 = arith.constant 0 : i32
    %c0_i32_0 = arith.constant 0 : i32
    %c0_i32_1 = arith.constant 0 : i32
    return %c0_i32, %c0_i32_0 : i32, i32
  }
  func.func @transform_7(%arg0: i32) -> (i32, i32) {
    %c0_i32 = arith.constant 0 : i32
    %c0_i32_0 = arith.constant 0 : i32
    return %arg0, %c0_i32 : i32, i32
  }
}

</mosaic_0001>

<bundles_post_ra>
// kernel: tpu_custom_call.1
= control target key start
LH: loop header
LB: loop body
LE: loop exit
PB: predicated region body
PF: predicated region fallthrough
CT: control target
= control target key end

     0   :  { %12 = vsyncpa [#allocation3], 0  ;;  %s795_s0 = inlined_call_operand.vmem [shape: f32[8,1], index: 0, kind: input, shape index: {}]   ;;  %s796_s1 = inlined_call_operand.vmem [shape: f32[1,128], index: 1, kind: input, shape index: {}]   ;;  %s797_s2 = inlined_call_operand.vmem [shape: f32[1,128], index: 2, kind: input, shape index: {}]   ;;  %s798_s3 = inlined_call_operand.hbm [shape: f32[128,128], index: 3, kind: input, shape index: {}]   ;;  %s799_s4 = inlined_call_operand.vmem [shape: f32[1,128], index: 4, kind: input, shape index: {}]   ;;  %s800_s5 = inlined_call_operand.hbm [shape: f32[128,128], index: 5, kind: input, shape index: {}]   ;;  %s801_s6 = inlined_call_operand.vmem [shape: f32[1,128], index: 6, kind: input, shape index: {}]   ;;  %s802_s7 = inlined_call_operand.hbm [shape: f32[8,128], index: 7, kind: output, shape index: {}]  }
   0x1   :  { %13 = vsyncpa [#allocation6], 0 }
   0x2   :  { %14 = vsyncpa [#allocation4], 0  ;;  %s652_s24 = smov [#allocation2]   ;;  %s580_s28 = scalar_lea.hbm %s798_s3, 2048 }
   0x3   :  { %s26_s25 = sshll.u32 %s652_s24, 4  ;;  %p581_p0 = scmp.ne.s32.totalorder %s798_s3, %s580_s28  ;;  %s27_s25 = int_to_ptr.vmem [resolvable:$true] %s26_s25 }
   0x4   :  { %p584_p1 = scmp.lt.u32.totalorder %s580_s28, %s798_s3 }
   0x6   :  { %p586_p2 = pnand %p584_p1, %p581_p0 }
   0x8   :  { %589 = shalt.err (!%p586_p2)
}
   0x9   :  { %s590_s10 = scalar_lea.vmem %s27_s25, 2048  ;;  %p595_p4 = scmp.lt.s32.totalorder %s27_s25, %s27_s25 }
   0xa   :  { %p591_p3 = scmp.ne.s32.totalorder %s27_s25, %s590_s10  ;;  %p596_p5 = scmp.lt.s32.totalorder %s590_s10, %s590_s10 }
   0xc   :  { %p597_p6 = por %p596_p5, %p595_p4 }
   0xe   :  { %p598_p7 = pnand %p597_p6, %p591_p3 }
  0x10   :  { %601 = shalt.err (!%p598_p7)
}
  0x11   :  { %s653_s11 = smov 128   ;;  %s654_s12 = smov 8  }
  0x12   :  { %32 = dma.hbm_to_vmem [thread:$0]  %s798_s3, 2048, %s27_s25, [#allocation3], %s653_s11, %s653_s11, %s654_s12  }
  0x13   :  { %s655_s15 = smov [#allocation5]   ;;  %s602_s19 = scalar_lea.hbm %s800_s5, 2048 }
  0x14   :  { %s40_s16 = sshll.u32 %s655_s15, 4  ;;  %p603_p8 = scmp.ne.s32.totalorder %s800_s5, %s602_s19  ;;  %s41_s16 = int_to_ptr.vmem [resolvable:$true] %s40_s16 }
  0x15   :  { %p606_p9 = scmp.lt.u32.totalorder %s602_s19, %s800_s5 }
  0x17   :  { %p608_p10 = pnand %p606_p9, %p603_p8 }
  0x19   :  { %611 = shalt.err (!%p608_p10)
}
  0x1a   :  { %s612_s24 = scalar_lea.vmem %s41_s16, 2048  ;;  %p617_p12 = scmp.lt.s32.totalorder %s41_s16, %s41_s16 }
  0x1b   :  { %p613_p11 = scmp.ne.s32.totalorder %s41_s16, %s612_s24  ;;  %p618_p13 = scmp.lt.s32.totalorder %s612_s24, %s612_s24 }
  0x1d   :  { %p619_p0 = por %p618_p13, %p617_p12 }
  0x1f   :  { %p620_p1 = pnand %p619_p0, %p613_p11 }
  0x21   :  { %623 = shalt.err (!%p620_p1)
}
  0x22   :  { %46 = dma.hbm_to_vmem [thread:$0]  %s800_s5, 2048, %s41_s16, [#allocation6], %s653_s11, %s653_s11, %s654_s12  }
  0x23   :  { %646 = dma.done.wait [#allocation3], 2048  }
  0x24   :  { %647 = vsyncadd [#allocation3], 4294965248 }
  0x25   :  { %648 = dma.done.wait [#allocation6], 2048  }
  0x26   :  { %649 = vsyncadd [#allocation6], 4294965248  ;;  %v656_v0 = vmov 0   ;;  %v55_v1 = vld [vmem:[%s795_s0] sm:$0xff]  ;;  %v182_v3 = vld [vmem:[#allocation2 + $0x8] sm:$0xff]  ;;  %v657_v5 = vmov 0.0|0.0  }
  0x27   :  { %571 = vset.pattern.permute.xlu0 %v656_v0  ;;  %v181_v2 = vld [vmem:[#allocation2] sm:$0xff]  ;;  %v183_v4 = vld [vmem:[#allocation2 + $0x10] sm:$0xff]  ;;  %504 = vmatprep.subr.bf16.mxu0 %v657_v5  ;;  %v184_v7 = vld [vmem:[#allocation2 + $0x18] sm:$0xff]  ;;  %vm658_vm0 = vmmov 0   ;;  %v659_v8 = vmov 0.0   ;;  %s666_s9 = smov [#allocation7]  }
  0x28   :  { %59 = vperm.xlu0 %571, %v55_v1   ;;  %v505_v6 = vpack.c.bf16 %v182_v3, %v181_v2  ;;  %466 = vmatprep.mubr.msk.f32.mxu0 %vm658_vm0, %v659_v8  ;;  %v508_v9 = vpack.c.bf16 %v184_v7, %v183_v4  ;;  %v185_v10 = vld [vmem:[#allocation2 + $0x20] sm:$0xff]  ;;  %v186_v11 = vld [vmem:[#allocation2 + $0x28] sm:$0xff]  ;;  %v187_v13 = vld [vmem:[#allocation2 + $0x30] sm:$0xff]  ;;  %v660_v44 = vmov 2102212464   ;;  %s381_s10 = sshll.u32 %s666_s9, 4  ;;  %s382_s10 = int_to_ptr.vmem [resolvable:$true] %s381_s10 }
  0x29   :  { %528 = vmatprep.subr.bf16.mxu1 %v657_v5  ;;  %501 = vmatprep.mubr.msk.f32.mxu1 %vm658_vm0, %v659_v8  ;;  %v511_v12 = vpack.c.bf16 %v186_v11, %v185_v10  ;;  %v188_v14 = vld [vmem:[#allocation2 + $0x38] sm:$0xff]  ;;  %v189_v16 = vld [vmem:[#allocation2 + $0x40] sm:$0xff]  ;;  %v190_v17 = vld [vmem:[#allocation2 + $0x48] sm:$0xff]  ;;  %v661_v46 = vmov 920167782   ;;  %p629_p3 = scmp.lt.s32.totalorder %s382_s10, %s382_s10 }
  0x2a   :  { %506 = vmatpush3.bf16.msra.mxu0 %v505_v6  ;;  %v514_v15 = vpack.c.bf16 %v188_v14, %v187_v13  ;;  %v517_v18 = vpack.c.bf16 %v190_v17, %v189_v16  ;;  %v191_v19 = vld [vmem:[#allocation2 + $0x50] sm:$0xff]  ;;  %v192_v20 = vld [vmem:[#allocation2 + $0x58] sm:$0xff]  ;;  %v193_v22 = vld [vmem:[#allocation2 + $0x60] sm:$0xff]  ;;  %v662_v50 = vmov 1326507024  }
  0x2b   :  { %507 = vmatprep.subr.bf16.mxu0 %v657_v5  ;;  %v520_v21 = vpack.c.bf16 %v192_v20, %v191_v19  ;;  %v194_v23 = vld [vmem:[#allocation2 + $0x68] sm:$0xff]  ;;  %v195_v25 = vld [vmem:[#allocation2 + $0x70] sm:$0xff]  ;;  %v196_v26 = vld [vmem:[#allocation2 + $0x78] sm:$0xff]  ;;  %v663_v52 = vmov 683565275  }
  0x2c   :  { %v523_v24 = vpack.c.bf16 %v194_v23, %v193_v22  ;;  %v526_v27 = vpack.c.bf16 %v196_v26, %v195_v25  ;;  %v391_v28 = vld [vmem:[%s796_s1] ss:$0 sm:$0xff]  ;;  %v664_v54 = vmov 2475754826   ;;  %v665_v57 = vmov 2131351028  }
  0x2d   :  { %v392_v29 = vld [vmem:[%s797_s2] ss:$0 sm:$0xff] }
  0x2e   :  { %509 = vmatpush3.bf16.msra.mxu0 %v508_v9 }
  0x2f   :  { %510 = vmatprep.subr.bf16.mxu0 %v657_v5 }
  0x32   :  { %512 = vmatpush3.bf16.msra.mxu0 %v511_v12 }
  0x33   :  { %513 = vmatprep.subr.bf16.mxu0 %v657_v5 }
  0x36   :  { %515 = vmatpush3.bf16.msra.mxu0 %v514_v15 }
  0x37   :  { %516 = vmatprep.subr.bf16.mxu0 %v657_v5 }
  0x3a   :  { %518 = vmatpush3.bf16.msra.mxu0 %v517_v18 }
  0x3b   :  { %519 = vmatprep.subr.bf16.mxu0 %v657_v5 }
  0x3e   :  { %521 = vmatpush3.bf16.msra.mxu0 %v520_v21 }
  0x3f   :  { %522 = vmatprep.subr.bf16.mxu0 %v657_v5 }
  0x42   :  { %524 = vmatpush3.bf16.msra.mxu0 %v523_v24 }
  0x43   :  { %525 = vmatprep.subr.bf16.mxu0 %v657_v5 }
  0x46   :  { %527 = vmatpush3.bf16.msra.mxu0 %v526_v27 }
  0xa7   :  { %v60_v30 = vpop.permute.xlu0 %59 }
  0xa8   :  { %v68_v31 = vmul.f32 %v391_v28, %v60_v30 }
  0xaa   :  { %v749_v32 = vadd.f32 %v392_v29, %v68_v31 }
  0xac   :  { %v80_v33 = vand.u32 2139095040, %v749_v32  ;;  %v77_v34 = vand.u32 2147483647, %v749_v32  ;;  %vm79_vm8 = vcmp.lt.s32.totalorder %v749_v32, 0  ;;  %vm169_vm13 = vweird.f32 %v749_v32 }
  0xae   :  { %v81_v35 = vshrl.u32 %v80_v33, 23  ;;  %v84_v37 = vand.u32 8388607, %v77_v34  ;;  %vm78_vm9 = vcmp.le.f32.partialorder %v77_v34, 0.7853982 }
  0xb0   :  { %v393_v36 = vadd.s32 4294967169, %v81_v35  ;;  %v85_v40 = vor.u32 8388608, %v84_v37 }
  0xb2   :  { %v87_v38 = vadd.s32 1, %v393_v36  ;;  %v125_v48 = vshll.u32 %v85_v40, 8 }
  0xb4   :  { %vm88_vm1 = vcmp.gt.s32.totalorder %v87_v38, 0 }
  0xb5   :  { %v89_v39 = vsel %vm88_vm1, %v87_v38, 0 }
  0xb6   :  { %v91_v41 = vand.u32 31, %v89_v39  ;;  %v90_v42 = vshrl.u32 %v89_v39, 5 }
  0xb8   :  { %v92_v43 = vsub.s32 32, %v91_v41  ;;  %v103_v45 = vshll.u32 %v660_v44, %v91_v41  ;;  %v106_v47 = vshll.u32 %v661_v46, %v91_v41  ;;  %v94_v53 = vshll.u32 %v663_v52, %v91_v41 }
  0xb9   :  { %v97_v56 = vshll.u32 %v664_v54, %v91_v41  ;;  %v100_v59 = vshll.u32 %v665_v57, %v91_v41  ;;  %vm112_vm2 = vcmp.lt.s32.totalorder %v90_v42, 4  ;;  %vm109_vm3 = vcmp.lt.s32.totalorder %v90_v42, 1 }
  0xba   :  { %v104_v49 = vshrl.u32 %v661_v46, %v92_v43  ;;  %v107_v51 = vshrl.u32 %v662_v50, %v92_v43  ;;  %v95_v55 = vshrl.u32 %v664_v54, %v92_v43  ;;  %v98_v58 = vshrl.u32 %v665_v57, %v92_v43 }
  0xbb   :  { %v101_v60 = vshrl.u32 %v660_v44, %v92_v43  ;;  %v93_v0 = vshrl.u32 %v663_v52, %v92_v43  ;;  %vm110_vm4 = vcmp.lt.s32.totalorder %v90_v42, 2  ;;  %vm111_vm5 = vcmp.lt.s32.totalorder %v90_v42, 3 }
  0xbc   :  { %v105_v61 = vor.u32 %v104_v49, %v103_v45  ;;  %v108_v62 = vor.u32 %v107_v51, %v106_v47  ;;  %v96_v63 = vor.u32 %v95_v55, %v94_v53  ;;  %v99_v1 = vor.u32 %v98_v58, %v97_v56 }
  0xbd   :  { %v102_v2 = vor.u32 %v101_v60, %v100_v59 }
  0xbe   :  { %v118_v3 = vsel %vm112_vm2, %v105_v61, 920167782  ;;  %v122_v4 = vsel %vm112_vm2, %v108_v62, 1326507024  ;;  %v117_v7 = vsel %vm109_vm3, %v96_v63, %v99_v1  ;;  %v113_v10 = vsel %vm109_vm3, %v93_v0, %v96_v63  ;;  %v281_v62 = vld [vmem:[#allocation5] sm:$0xff]  ;;  %v282_v63 = vld [vmem:[#allocation5 + $0x8] sm:$0xff] }
  0xbf   :  { %v114_v6 = vsel %vm112_vm2, %v102_v2, 2102212464  ;;  %v119_v8 = vsel %vm111_vm5, %v102_v2, %v118_v3  ;;  %v121_v9 = vsel %vm109_vm3, %v99_v1, %v102_v2  ;;  %v123_v13 = vsel %vm111_vm5, %v105_v61, %v122_v4  ;;  %v284_v2 = vld [vmem:[#allocation5 + $0x18] sm:$0xff]  ;;  %v285_v4 = vld [vmem:[#allocation5 + $0x20] sm:$0xff] }
  0xc0   :  { %v115_v11 = vsel %vm111_vm5, %v99_v1, %v114_v6  ;;  %v120_v12 = vsel %vm110_vm4, %v117_v7, %v119_v8  ;;  %v124_v14 = vsel %vm110_vm4, %v121_v9, %v123_v13  ;;  %v529_v0 = vpack.c.bf16 %v282_v63, %v281_v62  ;;  %v283_v1 = vld [vmem:[#allocation5 + $0x10] sm:$0xff]  ;;  %v286_v6 = vld [vmem:[#allocation5 + $0x28] sm:$0xff]  ;;  %v288_v8 = vld [vmem:[#allocation5 + $0x38] sm:$0xff] }
  0xc1   :  { %v755_v15 = vmul.u32.u64.low %v125_v48, %v120_v12  ;;  %v756_v16 = vmul.u32.u64.high %v125_v48, %v120_v12, %v755_v15  ;;  %v758_v17 = vmul.u32.u64.low %v125_v48, %v124_v14  ;;  %v759_v18 = vmul.u32.u64.high %v125_v48, %v124_v14, %v758_v17  ;;  %v291_v13 = vld [vmem:[#allocation5 + $0x50] sm:$0xff]  ;;  %v292_v14 = vld [vmem:[#allocation5 + $0x58] sm:$0xff] }
  0xc2   :  { %v116_v19 = vsel %vm110_vm4, %v113_v10, %v115_v11  ;;  %530 = vmatpush3.bf16.msra.mxu1 %v529_v0  ;;  %v532_v3 = vpack.c.bf16 %v284_v2, %v283_v1  ;;  %v535_v7 = vpack.c.bf16 %v286_v6, %v285_v4  ;;  %v289_v10 = vld [vmem:[#allocation5 + $0x40] sm:$0xff]  ;;  %v290_v11 = vld [vmem:[#allocation5 + $0x48] sm:$0xff] }
  0xc3   :  { %v135_v20 = vadd.s32 1, %v756_v16  ;;  %v132_v21 = vmul.u32 %v125_v48, %v116_v19  ;;  %vm134_vm6 = vc.u32 %v759_v18, %v755_v15  ;;  %v133_v35 = vadd.s32 %v755_v15, %v759_v18  ;;  %531 = vmatprep.subr.bf16.mxu1 %v657_v5  ;;  %v294_v17 = vld [vmem:[#allocation5 + $0x68] sm:$0xff]  ;;  %v295_v19 = vld [vmem:[#allocation5 + $0x70] sm:$0xff] }
  0xc4   :  { %v541_v12 = vpack.c.bf16 %v290_v11, %v289_v10  ;;  %v544_v15 = vpack.c.bf16 %v292_v14, %v291_v13 }
  0xc5   :  { %v136_v22 = vsel %vm134_vm6, %v135_v20, %v756_v16  ;;  %v293_v16 = vld [vmem:[#allocation5 + $0x60] sm:$0xff]  ;;  %v296_v20 = vld [vmem:[#allocation5 + $0x78] sm:$0xff] }
  0xc6   :  { %v137_v23 = vadd.s32 %v136_v22, %v132_v21  ;;  %533 = vmatpush3.bf16.msra.mxu1 %v532_v3  ;;  %v547_v18 = vpack.c.bf16 %v294_v17, %v293_v16  ;;  %v550_v21 = vpack.c.bf16 %v296_v20, %v295_v19  ;;  %v397_v22 = vld [vmem:[%s799_s4] ss:$0 sm:$0xff]  ;;  %s624_s4 = scalar_lea.vmem %s382_s10, 128 }
  0xc7   :  { %534 = vmatprep.subr.bf16.mxu1 %v657_v5  ;;  %p625_p2 = scmp.ne.s32.totalorder %s382_s10, %s624_s4  ;;  %p630_p4 = scmp.lt.s32.totalorder %s624_s4, %s624_s4 }
  0xc8   :  { %v138_v24 = vadd.s32 536870912, %v137_v23 }
  0xc9   :  { %p631_p5 = por %p630_p4, %p629_p3 }
  0xca   :  { %v139_v25 = vshrl.u32 %v138_v24, 30  ;;  %536 = vmatpush3.bf16.msra.mxu1 %v535_v7 }
  0xcb   :  { %537 = vmatprep.subr.bf16.mxu1 %v657_v5  ;;  %p632_p6 = pnand %p631_p5, %p625_p2 }
  0xcc   :  { %v140_v26 = vshll.u32 %v139_v25, 30  ;;  %v163_v47 = vsub.s32 4, %v139_v25 }
  0xce   :  { %v141_v27 = vsub.s32 %v137_v23, %v140_v26  ;;  %v164_v50 = vsel %vm79_vm8, %v163_v47, %v139_v25 }
  0xcf   :  { %v166_v52 = vsel %vm78_vm9, 0, %v164_v50 }
  0xd0   :  { %v143_v28 = vsub.s32 0, %v141_v27  ;;  %v170_v53 = vadd.s32 3, %v166_v52 }
  0xd2   :  { %v394_v29 = vmin.u32 %v143_v28, %v141_v27  ;;  %v171_v54 = vand.u32 3, %v170_v53 }
  0xd4   :  { %v145_v30 = vclz %v394_v29  ;;  %vm176_vm10 = vcmp.eq.s32.totalorder %v171_v54, 2  ;;  %vm173_vm11 = vcmp.eq.s32.totalorder %v171_v54, 0  ;;  %vm172_vm12 = vcmp.lt.s32.totalorder %v171_v54, 2 }
  0xd6   :  { %v395_v31 = vadd.s32 4294967294, %v145_v30 }
  0xd8   :  { %vm396_vm7 = vcmp.lt.s32.totalorder %v395_v31, 0 }
  0xd9   :  { %v148_v33 = vsel %vm396_vm7, 0, %v395_v31 }
  0xda   :  { %v149_v36 = vsub.s32 32, %v148_v33  ;;  %v153_v37 = vsub.s32 4294967266, %v148_v33  ;;  %v150_v38 = vshll.u32 %v141_v27, %v148_v33 }
  0xdc   :  { %v151_v39 = vshrl.u32 %v133_v35, %v149_v36  ;;  %v154_v40 = vadd.s32 127, %v153_v37 }
  0xde   :  { %v152_v41 = vor.u32 %v151_v39, %v150_v38  ;;  %v155_v42 = vshll.u32 %v154_v40, 23 }
  0xe0   :  { %v156_v43 = vor.u32 4788187, %v155_v42  ;;  %v159_v45 = vcvt.s32.f32 %v152_v41 }
  0xe2   :  { %v157_v44 = vand.u32 2147483647, %v156_v43 }
  0xe4   :  { %v160_v46 = vmul.f32 %v159_v45, %v157_v44 }
  0xe6   :  { %v161_v48 = vxor.u32 2147483648, %v160_v46 }
  0xe8   :  { %v162_v49 = vsel %vm79_vm8, %v161_v48, %v160_v46 }
  0xe9   :  { %v165_v51 = vsel %vm78_vm9, %v749_v32, %v162_v49  ;;  %v287_v32 = vld [vmem:[#allocation5 + $0x30] sm:$0xff] }
  0xea   :  { %572 = vcosq.f32 %v165_v51  ;;  %v538_v9 = vpack.c.bf16 %v288_v8, %v287_v32 }
  0xeb   :  { %574 = vsinq.f32 %v165_v51 }
  0xec   :  { %539 = vmatpush3.bf16.msra.mxu1 %v538_v9 }
  0xed   :  { %540 = vmatprep.subr.bf16.mxu1 %v657_v5 }
  0xf0   :  { %542 = vmatpush3.bf16.msra.mxu1 %v541_v12 }
  0xf1   :  { %543 = vmatprep.subr.bf16.mxu1 %v657_v5 }
  0xf4   :  { %v573_v55 = vpop.eup %572  ;;  %545 = vmatpush3.bf16.msra.mxu1 %v544_v15 }
  0xf5   :  { %v575_v56 = vpop.eup %574  ;;  %v177_v57 = vxor.u32 2147483648, %v573_v55  ;;  %546 = vmatprep.subr.bf16.mxu1 %v657_v5 }
  0xf6   :  { %v174_v58 = vxor.u32 2147483648, %v575_v56 }
  0xf7   :  { %v178_v59 = vsel %vm176_vm10, %v177_v57, %v575_v56 }
  0xf8   :  { %v175_v60 = vsel %vm173_vm11, %v573_v55, %v174_v58  ;;  %548 = vmatpush3.bf16.msra.mxu1 %v547_v18 }
  0xf9   :  { %v179_v34 = vsel %vm172_vm12, %v175_v60, %v178_v59  ;;  %549 = vmatprep.subr.bf16.mxu1 %v657_v5  ;;  %v399_v5 = vld [vmem:[%s801_s6] ss:$0 sm:$0xff] }
  0xfa   :  { %v180_v61 = vsel %vm169_vm13, nan, %v179_v34 }
  0xfb   :  { %467 = vmatmul.mubr.f32.vlgmr.msra.gmra.mrb[0].mxu0 %v180_v61 }
  0xfc   :  { %551 = vmatpush3.bf16.msra.mxu1 %v550_v21 }
 0x1ce   :  { %v270_v23 = vpop.f32.mrb[0].mxu0 }
 0x1cf   :  { %v271_v24 = vadd.f32 %v397_v22, %v270_v23  ;;  %v468_v25 = vpop.f32.mrb[1].mxu0 }
 0x1d1   :  { %v398_v26 = vmul.f32 -1.442695, %v271_v24 }
 0x1d3   :  { %576 = vpow2.f32 %v398_v26 }
 0x1dd   :  { %v577_v27 = vpop.eup %576 }
 0x1de   :  { %v277_v28 = vadd.f32 1.0, %v577_v27 }
 0x1e0   :  { %578 = vrcp.f32 %v277_v28 }
 0x1ea   :  { %v579_v29 = vpop.eup %578 }
 0x1eb   :  { %v280_v30 = vmul.f32 %v579_v29, %v271_v24 }
 0x1ed   :  { %502 = vmatmul.mubr.f32.vlgmr.msra.gmra.mrb[0].mxu1 %v280_v30 }
 0x2c0   :  { %v370_v31 = vpop.f32.mrb[0].mxu1 }
 0x2c1   :  { %v371_v33 = vadd.f32 %v399_v5, %v370_v31  ;;  %v503_v35 = vpop.f32.mrb[1].mxu1 }
 0x2c3   :  { %374 = vst [vmem:[#allocation7] sm:$0xff] %v371_v33 }
 0x2c4   :  { %635 = shalt.err (!%p632_p6)
}
 0x2c5   :  { %s636_s13 = scalar_lea.hbm %s802_s7, 128 }
 0x2c6   :  { %p637_p7 = scmp.ne.s32.totalorder %s802_s7, %s636_s13  ;;  %p640_p8 = scmp.lt.u32.totalorder %s636_s13, %s802_s7 }
 0x2c8   :  { %p642_p9 = pnand %p640_p8, %p637_p7 }
 0x2ca   :  { %645 = shalt.err (!%p642_p9)
}
 0x2cb   :  { %384 = dma.vmem_to_hbm [thread:$0]  %s382_s10, 128, %s802_s7, [#allocation4]  }
 0x2cc   :  { %650 = dma.done.wait [#allocation4], 128  }
 0x2cd   :  { %651 = vsyncadd [#allocation4], 4294967168 }
 0x2ce   :  { %388 = vsyncpa [#allocation3], 1 }
 0x2cf   :  { %389 = vsyncpa [#allocation6], 1 }
 0x2d0   :  { %390 = vsyncpa [#allocation4], 1 }

</bundles_post_ra>
